<compile_context>
chip_gen: v7x
topology: tpu7x:2x2x1
jax: 0.10.0
libtpu: 0.0.40
codegen_flags: <defaults>
</compile_context>

<pallas_src>
import functools

import jax
import jax.numpy as jnp
from jax.experimental import pallas as pl
from jax.experimental.pallas import tpu as pltpu


def _vmem_capacity_bytes():
    """Per-core VMEM capacity; falls back to 128 MiB if the query fails."""
    try:
        info = pltpu.get_tpu_info()
        cap = getattr(info, "vmem_capacity_bytes", None)
        if cap:
            return int(cap)
    except Exception:
        pass
    return 128 * 2 ** 20


def _pick_row_block(H, max_rows):
    """Largest row block <= max_rows that divides H and keeps (8,128) tiling."""
    if H <= max_rows:
        return H
    for cand in range(max_rows, 7, -1):
        if H % cand == 0 and cand % 8 == 0:
            return cand
    return H


def _aspp_kernel(xp_ref, w_ref, bias_ref, out_ref, xwin_ref, *,
                 rates, Hblk, W, C, pad, Hwin_pad):
    """One grid step == (batch b, row-block i); all rates computed in-kernel.

    xp_ref   : (1, Hp_tot, W*C)    bf16, H zero-padded, C fastest on lanes
    w_ref    : (R, 9, W*C)         f32, per-tap depthwise weights * BN scale,
                                   W-boundary lanes pre-zeroed per tap
    bias_ref : (R, W*C)            f32, folded BN bias (tiled over W)
    out_ref  : (1, R, Hblk, W*C)   bf16, cumulative branch sums (all rates)
    xwin_ref : (Hwin_pad, W*C)     f32 scratch, one-shot cast input window
    """
    i = pl.program_id(1)
    WC = W * C

    # Dynamic window start; hint 8-alignment when the block size allows it so
    # Mosaic avoids conservative unaligned-sublane load sequences.
    if Hblk % 8 == 0:
        row0 = pl.multiple_of(i * Hblk, 8)
    else:
        row0 = i * Hblk

    # Cast the (Hblk + 2*pad [+ align]) input window bf16 -> f32 exactly once;
    # every rate/tap slices from this scratch (static offsets).
    xwin_ref[...] = xp_ref[0, pl.ds(row0, Hwin_pad), :].astype(jnp.float32)

    # Center row slab (dh == 0) is shared by every rate -> hoist it.
    center = xwin_ref[pl.ds(pad, Hblk), :]

    acc = None  # running branch sum (temp = temp + branch), value-carried
    for ridx, rate in enumerate(rates):
        conv = None
        for di in range(3):
            dh = (di - 1) * rate
            rows = center if dh == 0 else xwin_ref[pl.ds(pad + dh, Hblk), :]
            for dj in range(3):
                dw = (dj - 1) * rate
                wt = w_ref[ridx, di * 3 + dj, :]
                if dw == 0:
                    win = rows
                else:
                    # W tap shift = lane rotation by dw*C lanes.  Wrapped
                    # lanes are harmless: the corresponding weight lanes were
                    # zeroed on the host (pre-baked zero padding in W).
                    win = pltpu.roll(rows, shift=(-dw * C) % WC, axis=1)
                term = win * wt[None, :]
                conv = term if conv is None else conv + term   # first-tap init
        # Folded eval-mode BatchNorm (scale already in weights) + ReLU.
        y = jnp.maximum(conv + bias_ref[ridx][None, :], 0.0)
        acc = y if acc is None else acc + y
        out_ref[0, ridx, :, :] = acc.astype(out_ref.dtype)


def aspp_forward(x_nchw, weights, bn_gamma, bn_beta, bn_mean, bn_var, rates,
                 eps=1e-5, out_dtype=jnp.bfloat16, channels_last=False):
    B, C, H, W = x_nchw.shape
    R = len(rates)
    rates = tuple(int(v) for v in rates)
    pad = max(rates)
    WC = W * C

    # Row-block size per generation: keep <=64 on 64 MiB VMEM parts (v7x),
    # allow bigger blocks on 128 MiB parts (v5e/v6e) to amortize per-step
    # overhead.  If B == 1, cap so there are >=2 (b, i) work units (megacore).
    cap = _vmem_capacity_bytes()
    max_rows = 64 if cap <= 64 * 2 ** 20 else 128
    if B == 1 and H >= 16:
        max_rows = min(max_rows, max(8, (H // 2) // 8 * 8))
    Hblk = _pick_row_block(H, max_rows)
    nI = H // Hblk

    # Input window rounded up to a multiple of 8 rows for aligned copies;
    # the wrapper pads a few extra zero rows so the last window stays in range.
    Hwin = Hblk + 2 * pad
    Hwin_pad = -(-Hwin // 8) * 8
    extra = Hwin_pad - Hwin
    Hp_tot = H + 2 * pad + extra

    # NCHW -> (B, H, W*C), C fastest on the lane axis; pad H only; ship bf16.
    x = jnp.transpose(x_nchw, (0, 2, 3, 1)).reshape(B, H, WC)
    xp = jnp.pad(x, ((0, 0), (pad, pad + extra), (0, 0))).astype(jnp.bfloat16)

    # Fold eval-mode BatchNorm into the weights (scale) and a per-channel bias.
    scale_c = (bn_gamma / jnp.sqrt(bn_var + eps)).astype(jnp.float32)   # (R,C)
    bias_c = (bn_beta - bn_mean * scale_c).astype(jnp.float32)          # (R,C)
    bias = jnp.tile(bias_c[:, None, :], (1, W, 1)).reshape(R, WC)

    # Depthwise weights (R,3,3,C) * BN scale, tiled over W with the conv's
    # zero padding in W pre-baked: for tap offset dw the output columns that
    # would read across the W boundary get a zero weight.  Kept in f32.
    w_scaled = weights.astype(jnp.float32) * scale_c[:, None, None, :]  # (R,3,3,C)
    wcol = jnp.arange(W)
    w_rows = []
    for ridx, rate in enumerate(rates):
        taps = []
        for di in range(3):
            for dj in range(3):
                dw = (dj - 1) * rate
                if dw > 0:
                    valid = (wcol < (W - dw)).astype(jnp.float32)
                elif dw < 0:
                    valid = (wcol >= (-dw)).astype(jnp.float32)
                else:
                    valid = jnp.ones((W,), jnp.float32)
                tap = w_scaled[ridx, di, dj][None, :] * valid[:, None]  # (W,C)
                taps.append(tap.reshape(WC))
        w_rows.append(jnp.stack(taps, 0))                               # (9,WC)
    w_tiled = jnp.stack(w_rows, 0)                                      # (R,9,WC)

    kernel = functools.partial(_aspp_kernel, rates=rates, Hblk=Hblk,
                               W=W, C=C, pad=pad, Hwin_pad=Hwin_pad)

    # VMEM budget for the working set (double-buffered blocks + scratch),
    # clamped to the generation's physical capacity minus headroom.
    est = (2 * Hp_tot * WC * 2          # resident H-padded input (bf16)
           + 2 * R * 9 * WC * 4         # resident weights (f32)
           + 2 * R * WC * 4             # resident bias (f32)
           + 2 * R * Hblk * WC * 2      # output block (bf16)
           + Hwin_pad * WC * 4)         # input-window scratch (f32)
    vmem_limit = int(min(cap - 8 * 2 ** 20, max(16 * 2 ** 20, 3 * est)))

    out = pl.pallas_call(
        kernel,
        out_shape=jax.ShapeDtypeStruct((B, R, H, WC), out_dtype),
        grid_spec=pltpu.PrefetchScalarGridSpec(
            num_scalar_prefetch=0,
            grid=(B, nI),
            in_specs=[
                # Full H-padded image per batch; block index only changes with
                # b, so it stays resident across row blocks.
                pl.BlockSpec((1, Hp_tot, WC), lambda b, i: (b, 0, 0)),
                # Weights / BN bias: constant block index -> loaded once.
                pl.BlockSpec((R, 9, WC), lambda b, i: (0, 0, 0)),
                pl.BlockSpec((R, WC), lambda b, i: (0, 0)),
            ],
            out_specs=pl.BlockSpec((1, R, Hblk, WC), lambda b, i: (b, 0, i, 0)),
            scratch_shapes=[pltpu.VMEM((Hwin_pad, WC), jnp.float32)],
        ),
        compiler_params=pltpu.CompilerParams(
            dimension_semantics=("parallel", "parallel"),
            vmem_limit_bytes=vmem_limit),
    )(xp, w_tiled, bias)

    out5 = out.reshape(B, R, H, W, C)
    if channels_last:
        # Skip the NCHW transpose entirely for channels-last consumers.
        return out5
    # (B, R, H, W, C) -> (B, R*C, H, W), matching torch.cat(outs, dim=1).
    # Done in bf16 (half the transpose traffic of the previous f32 version).
    return out5.transpose(0, 1, 4, 2, 3).reshape(B, R * C, H, W)


def aspp_reference(x_nchw, weights, gamma, beta, mean, var, rates, eps=1e-5):
    """Pure-JAX reference mirroring the PyTorch forward (eval-mode BN)."""
    B, C, H, W = x_nchw.shape
    x = x_nchw.astype(jnp.float32)
    outs = []
    temp = 0.0
    for r, rate in enumerate(rates):
        w_oihw = jnp.transpose(weights[r], (2, 0, 1))[:, None, :, :]  # (C,1,3,3)
        y = jax.lax.conv_general_dilated(
            x, w_oihw, window_strides=(1, 1),
            padding=((rate, rate), (rate, rate)),
            rhs_dilation=(rate, rate),
            dimension_numbers=('NCHW', 'OIHW', 'NCHW'),
            feature_group_count=C)
        y = (y - mean[r][None, :, None, None]) / jnp.sqrt(
            var[r][None, :, None, None] + eps)
        y = y * gamma[r][None, :, None, None] + beta[r][None, :, None, None]
        y = jnp.maximum(y, 0.0)
        temp = temp + y
        outs.append(temp)
    return jnp.concatenate(outs, axis=1)


if __name__ == "__main__":
    key = jax.random.PRNGKey(0)
    B, C, H, W = 2, 8, 16, 16           # inplanes = 8, W*C = 128
    rates = (1, 2, 3)
    R = len(rates)

    k_x, k_w = jax.random.split(key)
    x = jax.random.normal(k_x, (B, C, H, W), jnp.float32)
    # kaiming_normal_ for depthwise conv: fan_in = 1*3*3
    weights = jax.random.normal(k_w, (R, 3, 3, C), jnp.float32) * (2.0 / 9.0) ** 0.5
    gamma = jnp.ones((R, C), jnp.float32)    # BN weight filled with 1
    beta = jnp.zeros((R, C), jnp.float32)    # BN bias zeroed
    mean = jnp.zeros((R, C), jnp.float32)    # default running_mean
    var = jnp.ones((R, C), jnp.float32)      # default running_var

    out = aspp_forward(x, weights, gamma, beta, mean, var, rates)
    out = jax.block_until_ready(out)

    # Reference on the same bf16-rounded input the kernel sees over HBM
    # (weights/BN now travel in f32).  Output is bf16, so tolerance is set by
    # bf16 rounding (~0.2% relative) rather than the old 1e-4.
    x_bf = x.astype(jnp.bfloat16).astype(jnp.float32)
    ref = aspp_reference(x_bf, weights, gamma, beta, mean, var, rates)

    assert out.shape == (B, R * C, H, W), out.shape
    err = float(jnp.max(jnp.abs(out.astype(jnp.float32) - ref)))
    assert err < 5e-2, err
    print("KERNEL_OK")
</pallas_src>

<mosaic_0001>
module attributes {stable_mosaic.version = 11 : i64} {
  func.func @_aspp_kernel(%arg0: i32, %arg1: i32, %arg2: memref<1x24x128xbf16, #tpu.memory_space<vmem>>, %arg3: memref<3x9x128xf32, #tpu.memory_space<vmem>>, %arg4: memref<3x128xf32, #tpu.memory_space<vmem>>, %arg5: memref<1x3x16x128xbf16, #tpu.memory_space<vmem>>, %arg6: memref<24x128xf32, #tpu.memory_space<vmem>>) attributes {dimension_semantics = [#tpu.dimension_semantics<parallel>, #tpu.dimension_semantics<parallel>], iteration_bounds = array<i64: 2, 1>, scalar_prefetch = 0 : i64, scratch_operands = 1 : i64, tpu.core_type = #tpu.core_type<tc>, window_params = [{transform_indices = @transform_0, window_bounds = array<i64: 1, 24, 128>}, {pipeline_mode = #tpu.pipeline_mode<synchronous>, transform_indices = @transform_1, window_bounds = array<i64: 3, 9, 128>}, {pipeline_mode = #tpu.pipeline_mode<synchronous>, transform_indices = @transform_2, window_bounds = array<i64: 3, 128>}, {transform_indices = @transform_3, window_bounds = array<i64: 1, 3, 16, 128>}]} {
    %c16_i32 = arith.constant 16 : i32
    %0 = arith.muli %arg1, %c16_i32 : i32
    %1 = tpu.assume_multiple %0, 8 : i32
    %c0 = arith.constant 0 : index
    %2 = arith.index_cast %1 : i32 to index
    %c0_0 = arith.constant 0 : index
    %3 = vector.load %arg2[%c0, %2, %c0_0] : memref<1x24x128xbf16, #tpu.memory_space<vmem>>, vector<1x24x128xbf16>
    %4 = vector.shape_cast %3 : vector<1x24x128xbf16> to vector<24x128xbf16>
    %5 = arith.extf %4 : vector<24x128xbf16> to vector<24x128xf32>
    %c0_1 = arith.constant 0 : index
    %c0_2 = arith.constant 0 : index
    %6 = vector.load %arg6[%c0_1, %c0_2] : memref<24x128xf32, #tpu.memory_space<vmem>>, vector<24x128xf32>
    tpu.vector_store %arg6[%c0_1, %c0_2], %5 {strides = array<i32>} : memref<24x128xf32, #tpu.memory_space<vmem>>, vector<24x128xf32>,
    %c3 = arith.constant 3 : index
    %c0_3 = arith.constant 0 : index
    %7 = vector.load %arg6[%c3, %c0_3] : memref<24x128xf32, #tpu.memory_space<vmem>>, vector<16x128xf32>
    %c2 = arith.constant 2 : index
    %c0_4 = arith.constant 0 : index
    %8 = vector.load %arg6[%c2, %c0_4] : memref<24x128xf32, #tpu.memory_space<vmem>>, vector<16x128xf32>
    %c0_5 = arith.constant 0 : index
    %c0_6 = arith.constant 0 : index
    %c0_7 = arith.constant 0 : index
    %9 = vector.load %arg3[%c0_5, %c0_6, %c0_7] : memref<3x9x128xf32, #tpu.memory_space<vmem>>, vector<1x1x128xf32>
    %10 = vector.shape_cast %9 : vector<1x1x128xf32> to vector<128xf32>
    %c8_i32 = arith.constant 8 : i32
    %11 = tpu.dynamic_rotate %8 by %c8_i32 dim 1 : vector<16x128xf32>, i32 -> vector<16x128xf32>
    %12 = vector.shape_cast %10 : vector<128xf32> to vector<1x128xf32>
    %13 = vector.broadcast %12 : vector<1x128xf32> to vector<16x128xf32>
    %14 = arith.mulf %11, %13 : vector<16x128xf32>
    %c0_8 = arith.constant 0 : index
    %c1 = arith.constant 1 : index
    %c0_9 = arith.constant 0 : index
    %15 = vector.load %arg3[%c0_8, %c1, %c0_9] : memref<3x9x128xf32, #tpu.memory_space<vmem>>, vector<1x1x128xf32>
    %16 = vector.shape_cast %15 : vector<1x1x128xf32> to vector<128xf32>
    %17 = vector.shape_cast %16 : vector<128xf32> to vector<1x128xf32>
    %18 = vector.broadcast %17 : vector<1x128xf32> to vector<16x128xf32>
    %19 = arith.mulf %8, %18 : vector<16x128xf32>
    %20 = arith.addf %14, %19 : vector<16x128xf32>
    %c0_10 = arith.constant 0 : index
    %c2_11 = arith.constant 2 : index
    %c0_12 = arith.constant 0 : index
    %21 = vector.load %arg3[%c0_10, %c2_11, %c0_12] : memref<3x9x128xf32, #tpu.memory_space<vmem>>, vector<1x1x128xf32>
    %22 = vector.shape_cast %21 : vector<1x1x128xf32> to vector<128xf32>
    %c120_i32 = arith.constant 120 : i32
    %23 = tpu.dynamic_rotate %8 by %c120_i32 dim 1 : vector<16x128xf32>, i32 -> vector<16x128xf32>
    %24 = vector.shape_cast %22 : vector<128xf32> to vector<1x128xf32>
    %25 = vector.broadcast %24 : vector<1x128xf32> to vector<16x128xf32>
    %26 = arith.mulf %23, %25 : vector<16x128xf32>
    %27 = arith.addf %20, %26 : vector<16x128xf32>
    %c0_13 = arith.constant 0 : index
    %c3_14 = arith.constant 3 : index
    %c0_15 = arith.constant 0 : index
    %28 = vector.load %arg3[%c0_13, %c3_14, %c0_15] : memref<3x9x128xf32, #tpu.memory_space<vmem>>, vector<1x1x128xf32>
    %29 = vector.shape_cast %28 : vector<1x1x128xf32> to vector<128xf32>
    %c8_i32_16 = arith.constant 8 : i32
    %30 = tpu.dynamic_rotate %7 by %c8_i32_16 dim 1 : vector<16x128xf32>, i32 -> vector<16x128xf32>
    %31 = vector.shape_cast %29 : vector<128xf32> to vector<1x128xf32>
    %32 = vector.broadcast %31 : vector<1x128xf32> to vector<16x128xf32>
    %33 = arith.mulf %30, %32 : vector<16x128xf32>
    %34 = arith.addf %27, %33 : vector<16x128xf32>
    %c0_17 = arith.constant 0 : index
    %c4 = arith.constant 4 : index
    %c0_18 = arith.constant 0 : index
    %35 = vector.load %arg3[%c0_17, %c4, %c0_18] : memref<3x9x128xf32, #tpu.memory_space<vmem>>, vector<1x1x128xf32>
    %36 = vector.shape_cast %35 : vector<1x1x128xf32> to vector<128xf32>
    %37 = vector.shape_cast %36 : vector<128xf32> to vector<1x128xf32>
    %38 = vector.broadcast %37 : vector<1x128xf32> to vector<16x128xf32>
    %39 = arith.mulf %7, %38 : vector<16x128xf32>
    %40 = arith.addf %34, %39 : vector<16x128xf32>
    %c0_19 = arith.constant 0 : index
    %c5 = arith.constant 5 : index
    %c0_20 = arith.constant 0 : index
    %41 = vector.load %arg3[%c0_19, %c5, %c0_20] : memref<3x9x128xf32, #tpu.memory_space<vmem>>, vector<1x1x128xf32>
    %42 = vector.shape_cast %41 : vector<1x1x128xf32> to vector<128xf32>
    %c120_i32_21 = arith.constant 120 : i32
    %43 = tpu.dynamic_rotate %7 by %c120_i32_21 dim 1 : vector<16x128xf32>, i32 -> vector<16x128xf32>
    %44 = vector.shape_cast %42 : vector<128xf32> to vector<1x128xf32>
    %45 = vector.broadcast %44 : vector<1x128xf32> to vector<16x128xf32>
    %46 = arith.mulf %43, %45 : vector<16x128xf32>
    %47 = arith.addf %40, %46 : vector<16x128xf32>
    %c4_22 = arith.constant 4 : index
    %c0_23 = arith.constant 0 : index
    %48 = vector.load %arg6[%c4_22, %c0_23] : memref<24x128xf32, #tpu.memory_space<vmem>>, vector<16x128xf32>
    %c0_24 = arith.constant 0 : index
    %c6 = arith.constant 6 : index
    %c0_25 = arith.constant 0 : index
    %49 = vector.load %arg3[%c0_24, %c6, %c0_25] : memref<3x9x128xf32, #tpu.memory_space<vmem>>, vector<1x1x128xf32>
    %50 = vector.shape_cast %49 : vector<1x1x128xf32> to vector<128xf32>
    %c8_i32_26 = arith.constant 8 : i32
    %51 = tpu.dynamic_rotate %48 by %c8_i32_26 dim 1 : vector<16x128xf32>, i32 -> vector<16x128xf32>
    %52 = vector.shape_cast %50 : vector<128xf32> to vector<1x128xf32>
    %53 = vector.broadcast %52 : vector<1x128xf32> to vector<16x128xf32>
    %54 = arith.mulf %51, %53 : vector<16x128xf32>
    %55 = arith.addf %47, %54 : vector<16x128xf32>
    %c0_27 = arith.constant 0 : index
    %c7 = arith.constant 7 : index
    %c0_28 = arith.constant 0 : index
    %56 = vector.load %arg3[%c0_27, %c7, %c0_28] : memref<3x9x128xf32, #tpu.memory_space<vmem>>, vector<1x1x128xf32>
    %57 = vector.shape_cast %56 : vector<1x1x128xf32> to vector<128xf32>
    %58 = vector.shape_cast %57 : vector<128xf32> to vector<1x128xf32>
    %59 = vector.broadcast %58 : vector<1x128xf32> to vector<16x128xf32>
    %60 = arith.mulf %48, %59 : vector<16x128xf32>
    %61 = arith.addf %55, %60 : vector<16x128xf32>
    %c0_29 = arith.constant 0 : index
    %c8 = arith.constant 8 : index
    %c0_30 = arith.constant 0 : index
    %62 = vector.load %arg3[%c0_29, %c8, %c0_30] : memref<3x9x128xf32, #tpu.memory_space<vmem>>, vector<1x1x128xf32>
    %63 = vector.shape_cast %62 : vector<1x1x128xf32> to vector<128xf32>
    %c120_i32_31 = arith.constant 120 : i32
    %64 = tpu.dynamic_rotate %48 by %c120_i32_31 dim 1 : vector<16x128xf32>, i32 -> vector<16x128xf32>
    %65 = vector.shape_cast %63 : vector<128xf32> to vector<1x128xf32>
    %66 = vector.broadcast %65 : vector<1x128xf32> to vector<16x128xf32>
    %67 = arith.mulf %64, %66 : vector<16x128xf32>
    %68 = arith.addf %61, %67 : vector<16x128xf32>
    %c0_32 = arith.constant 0 : index
    %c0_33 = arith.constant 0 : index
    %69 = vector.load %arg4[%c0_32, %c0_33] : memref<3x128xf32, #tpu.memory_space<vmem>>, vector<1x128xf32>
    %70 = vector.shape_cast %69 : vector<1x128xf32> to vector<128xf32>
    %71 = vector.shape_cast %70 : vector<128xf32> to vector<1x128xf32>
    %72 = vector.broadcast %71 : vector<1x128xf32> to vector<16x128xf32>
    %73 = arith.addf %68, %72 : vector<16x128xf32>
    %cst = arith.constant 0.000000e+00 : f32
    %74 = vector.broadcast %cst : f32 to vector<16x128xf32>
    %75 = arith.maximumf %73, %74 : vector<16x128xf32>
    %76 = arith.truncf %75 : vector<16x128xf32> to vector<16x128xbf16>
    %c0_34 = arith.constant 0 : index
    %c0_35 = arith.constant 0 : index
    %c0_36 = arith.constant 0 : index
    %c0_37 = arith.constant 0 : index
    %77 = vector.load %arg5[%c0_34, %c0_35, %c0_36, %c0_37] : memref<1x3x16x128xbf16, #tpu.memory_space<vmem>>, vector<1x1x16x128xbf16>
    %78 = vector.shape_cast %77 : vector<1x1x16x128xbf16> to vector<16x128xbf16>
    %79 = vector.shape_cast %76 : vector<16x128xbf16> to vector<1x1x16x128xbf16>
    tpu.vector_store %arg5[%c0_34, %c0_35, %c0_36, %c0_37], %79 {strides = array<i32>} : memref<1x3x16x128xbf16, #tpu.memory_space<vmem>>, vector<1x1x16x128xbf16>,
    %c1_38 = arith.constant 1 : index
    %c0_39 = arith.constant 0 : index
    %80 = vector.load %arg6[%c1_38, %c0_39] : memref<24x128xf32, #tpu.memory_space<vmem>>, vector<16x128xf32>
    %c1_40 = arith.constant 1 : index
    %c0_41 = arith.constant 0 : index
    %c0_42 = arith.constant 0 : index
    %81 = vector.load %arg3[%c1_40, %c0_41, %c0_42] : memref<3x9x128xf32, #tpu.memory_space<vmem>>, vector<1x1x128xf32>
    %82 = vector.shape_cast %81 : vector<1x1x128xf32> to vector<128xf32>
    %c16_i32_43 = arith.constant 16 : i32
    %83 = tpu.dynamic_rotate %80 by %c16_i32_43 dim 1 : vector<16x128xf32>, i32 -> vector<16x128xf32>
    %84 = vector.shape_cast %82 : vector<128xf32> to vector<1x128xf32>
    %85 = vector.broadcast %84 : vector<1x128xf32> to vector<16x128xf32>
    %86 = arith.mulf %83, %85 : vector<16x128xf32>
    %c1_44 = arith.constant 1 : index
    %c1_45 = arith.constant 1 : index
    %c0_46 = arith.constant 0 : index
    %87 = vector.load %arg3[%c1_44, %c1_45, %c0_46] : memref<3x9x128xf32, #tpu.memory_space<vmem>>, vector<1x1x128xf32>
    %88 = vector.shape_cast %87 : vector<1x1x128xf32> to vector<128xf32>
    %89 = vector.shape_cast %88 : vector<128xf32> to vector<1x128xf32>
    %90 = vector.broadcast %89 : vector<1x128xf32> to vector<16x128xf32>
    %91 = arith.mulf %80, %90 : vector<16x128xf32>
    %92 = arith.addf %86, %91 : vector<16x128xf32>
    %c1_47 = arith.constant 1 : index
    %c2_48 = arith.constant 2 : index
    %c0_49 = arith.constant 0 : index
    %93 = vector.load %arg3[%c1_47, %c2_48, %c0_49] : memref<3x9x128xf32, #tpu.memory_space<vmem>>, vector<1x1x128xf32>
    %94 = vector.shape_cast %93 : vector<1x1x128xf32> to vector<128xf32>
    %c112_i32 = arith.constant 112 : i32
    %95 = tpu.dynamic_rotate %80 by %c112_i32 dim 1 : vector<16x128xf32>, i32 -> vector<16x128xf32>
    %96 = vector.shape_cast %94 : vector<128xf32> to vector<1x128xf32>
    %97 = vector.broadcast %96 : vector<1x128xf32> to vector<16x128xf32>
    %98 = arith.mulf %95, %97 : vector<16x128xf32>
    %99 = arith.addf %92, %98 : vector<16x128xf32>
    %c1_50 = arith.constant 1 : index
    %c3_51 = arith.constant 3 : index
    %c0_52 = arith.constant 0 : index
    %100 = vector.load %arg3[%c1_50, %c3_51, %c0_52] : memref<3x9x128xf32, #tpu.memory_space<vmem>>, vector<1x1x128xf32>
    %101 = vector.shape_cast %100 : vector<1x1x128xf32> to vector<128xf32>
    %c16_i32_53 = arith.constant 16 : i32
    %102 = tpu.dynamic_rotate %7 by %c16_i32_53 dim 1 : vector<16x128xf32>, i32 -> vector<16x128xf32>
    %103 = vector.shape_cast %101 : vector<128xf32> to vector<1x128xf32>
    %104 = vector.broadcast %103 : vector<1x128xf32> to vector<16x128xf32>
    %105 = arith.mulf %102, %104 : vector<16x128xf32>
    %106 = arith.addf %99, %105 : vector<16x128xf32>
    %c1_54 = arith.constant 1 : index
    %c4_55 = arith.constant 4 : index
    %c0_56 = arith.constant 0 : index
    %107 = vector.load %arg3[%c1_54, %c4_55, %c0_56] : memref<3x9x128xf32, #tpu.memory_space<vmem>>, vector<1x1x128xf32>
    %108 = vector.shape_cast %107 : vector<1x1x128xf32> to vector<128xf32>
    %109 = vector.shape_cast %108 : vector<128xf32> to vector<1x128xf32>
    %110 = vector.broadcast %109 : vector<1x128xf32> to vector<16x128xf32>
    %111 = arith.mulf %7, %110 : vector<16x128xf32>
    %112 = arith.addf %106, %111 : vector<16x128xf32>
    %c1_57 = arith.constant 1 : index
    %c5_58 = arith.constant 5 : index
    %c0_59 = arith.constant 0 : index
    %113 = vector.load %arg3[%c1_57, %c5_58, %c0_59] : memref<3x9x128xf32, #tpu.memory_space<vmem>>, vector<1x1x128xf32>
    %114 = vector.shape_cast %113 : vector<1x1x128xf32> to vector<128xf32>
    %c112_i32_60 = arith.constant 112 : i32
    %115 = tpu.dynamic_rotate %7 by %c112_i32_60 dim 1 : vector<16x128xf32>, i32 -> vector<16x128xf32>
    %116 = vector.shape_cast %114 : vector<128xf32> to vector<1x128xf32>
    %117 = vector.broadcast %116 : vector<1x128xf32> to vector<16x128xf32>
    %118 = arith.mulf %115, %117 : vector<16x128xf32>
    %119 = arith.addf %112, %118 : vector<16x128xf32>
    %c5_61 = arith.constant 5 : index
    %c0_62 = arith.constant 0 : index
    %120 = vector.load %arg6[%c5_61, %c0_62] : memref<24x128xf32, #tpu.memory_space<vmem>>, vector<16x128xf32>
    %c1_63 = arith.constant 1 : index
    %c6_64 = arith.constant 6 : index
    %c0_65 = arith.constant 0 : index
    %121 = vector.load %arg3[%c1_63, %c6_64, %c0_65] : memref<3x9x128xf32, #tpu.memory_space<vmem>>, vector<1x1x128xf32>
    %122 = vector.shape_cast %121 : vector<1x1x128xf32> to vector<128xf32>
    %c16_i32_66 = arith.constant 16 : i32
    %123 = tpu.dynamic_rotate %120 by %c16_i32_66 dim 1 : vector<16x128xf32>, i32 -> vector<16x128xf32>
    %124 = vector.shape_cast %122 : vector<128xf32> to vector<1x128xf32>
    %125 = vector.broadcast %124 : vector<1x128xf32> to vector<16x128xf32>
    %126 = arith.mulf %123, %125 : vector<16x128xf32>
    %127 = arith.addf %119, %126 : vector<16x128xf32>
    %c1_67 = arith.constant 1 : index
    %c7_68 = arith.constant 7 : index
    %c0_69 = arith.constant 0 : index
    %128 = vector.load %arg3[%c1_67, %c7_68, %c0_69] : memref<3x9x128xf32, #tpu.memory_space<vmem>>, vector<1x1x128xf32>
    %129 = vector.shape_cast %128 : vector<1x1x128xf32> to vector<128xf32>
    %130 = vector.shape_cast %129 : vector<128xf32> to vector<1x128xf32>
    %131 = vector.broadcast %130 : vector<1x128xf32> to vector<16x128xf32>
    %132 = arith.mulf %120, %131 : vector<16x128xf32>
    %133 = arith.addf %127, %132 : vector<16x128xf32>
    %c1_70 = arith.constant 1 : index
    %c8_71 = arith.constant 8 : index
    %c0_72 = arith.constant 0 : index
    %134 = vector.load %arg3[%c1_70, %c8_71, %c0_72] : memref<3x9x128xf32, #tpu.memory_space<vmem>>, vector<1x1x128xf32>
    %135 = vector.shape_cast %134 : vector<1x1x128xf32> to vector<128xf32>
    %c112_i32_73 = arith.constant 112 : i32
    %136 = tpu.dynamic_rotate %120 by %c112_i32_73 dim 1 : vector<16x128xf32>, i32 -> vector<16x128xf32>
    %137 = vector.shape_cast %135 : vector<128xf32> to vector<1x128xf32>
    %138 = vector.broadcast %137 : vector<1x128xf32> to vector<16x128xf32>
    %139 = arith.mulf %136, %138 : vector<16x128xf32>
    %140 = arith.addf %133, %139 : vector<16x128xf32>
    %c1_74 = arith.constant 1 : index
    %c0_75 = arith.constant 0 : index
    %141 = vector.load %arg4[%c1_74, %c0_75] : memref<3x128xf32, #tpu.memory_space<vmem>>, vector<1x128xf32>
    %142 = vector.shape_cast %141 : vector<1x128xf32> to vector<128xf32>
    %143 = vector.shape_cast %142 : vector<128xf32> to vector<1x128xf32>
    %144 = vector.broadcast %143 : vector<1x128xf32> to vector<16x128xf32>
    %145 = arith.addf %140, %144 : vector<16x128xf32>
    %cst_76 = arith.constant 0.000000e+00 : f32
    %146 = vector.broadcast %cst_76 : f32 to vector<16x128xf32>
    %147 = arith.maximumf %145, %146 : vector<16x128xf32>
    %148 = arith.addf %75, %147 : vector<16x128xf32>
    %149 = arith.truncf %148 : vector<16x128xf32> to vector<16x128xbf16>
    %c0_77 = arith.constant 0 : index
    %c1_78 = arith.constant 1 : index
    %c0_79 = arith.constant 0 : index
    %c0_80 = arith.constant 0 : index
    %150 = vector.load %arg5[%c0_77, %c1_78, %c0_79, %c0_80] : memref<1x3x16x128xbf16, #tpu.memory_space<vmem>>, vector<1x1x16x128xbf16>
    %151 = vector.shape_cast %150 : vector<1x1x16x128xbf16> to vector<16x128xbf16>
    %152 = vector.shape_cast %149 : vector<16x128xbf16> to vector<1x1x16x128xbf16>
    tpu.vector_store %arg5[%c0_77, %c1_78, %c0_79, %c0_80], %152 {strides = array<i32>} : memref<1x3x16x128xbf16, #tpu.memory_space<vmem>>, vector<1x1x16x128xbf16>,
    %c0_81 = arith.constant 0 : index
    %c0_82 = arith.constant 0 : index
    %153 = vector.load %arg6[%c0_81, %c0_82] : memref<24x128xf32, #tpu.memory_space<vmem>>, vector<16x128xf32>
    %c2_83 = arith.constant 2 : index
    %c0_84 = arith.constant 0 : index
    %c0_85 = arith.constant 0 : index
    %154 = vector.load %arg3[%c2_83, %c0_84, %c0_85] : memref<3x9x128xf32, #tpu.memory_space<vmem>>, vector<1x1x128xf32>
    %155 = vector.shape_cast %154 : vector<1x1x128xf32> to vector<128xf32>
    %c24_i32 = arith.constant 24 : i32
    %156 = tpu.dynamic_rotate %153 by %c24_i32 dim 1 : vector<16x128xf32>, i32 -> vector<16x128xf32>
    %157 = vector.shape_cast %155 : vector<128xf32> to vector<1x128xf32>
    %158 = vector.broadcast %157 : vector<1x128xf32> to vector<16x128xf32>
    %159 = arith.mulf %156, %158 : vector<16x128xf32>
    %c2_86 = arith.constant 2 : index
    %c1_87 = arith.constant 1 : index
    %c0_88 = arith.constant 0 : index
    %160 = vector.load %arg3[%c2_86, %c1_87, %c0_88] : memref<3x9x128xf32, #tpu.memory_space<vmem>>, vector<1x1x128xf32>
    %161 = vector.shape_cast %160 : vector<1x1x128xf32> to vector<128xf32>
    %162 = vector.shape_cast %161 : vector<128xf32> to vector<1x128xf32>
    %163 = vector.broadcast %162 : vector<1x128xf32> to vector<16x128xf32>
    %164 = arith.mulf %153, %163 : vector<16x128xf32>
    %165 = arith.addf %159, %164 : vector<16x128xf32>
    %c2_89 = arith.constant 2 : index
    %c2_90 = arith.constant 2 : index
    %c0_91 = arith.constant 0 : index
    %166 = vector.load %arg3[%c2_89, %c2_90, %c0_91] : memref<3x9x128xf32, #tpu.memory_space<vmem>>, vector<1x1x128xf32>
    %167 = vector.shape_cast %166 : vector<1x1x128xf32> to vector<128xf32>
    %c104_i32 = arith.constant 104 : i32
    %168 = tpu.dynamic_rotate %153 by %c104_i32 dim 1 : vector<16x128xf32>, i32 -> vector<16x128xf32>
    %169 = vector.shape_cast %167 : vector<128xf32> to vector<1x128xf32>
    %170 = vector.broadcast %169 : vector<1x128xf32> to vector<16x128xf32>
    %171 = arith.mulf %168, %170 : vector<16x128xf32>
    %172 = arith.addf %165, %171 : vector<16x128xf32>
    %c2_92 = arith.constant 2 : index
    %c3_93 = arith.constant 3 : index
    %c0_94 = arith.constant 0 : index
    %173 = vector.load %arg3[%c2_92, %c3_93, %c0_94] : memref<3x9x128xf32, #tpu.memory_space<vmem>>, vector<1x1x128xf32>
    %174 = vector.shape_cast %173 : vector<1x1x128xf32> to vector<128xf32>
    %c24_i32_95 = arith.constant 24 : i32
    %175 = tpu.dynamic_rotate %7 by %c24_i32_95 dim 1 : vector<16x128xf32>, i32 -> vector<16x128xf32>
    %176 = vector.shape_cast %174 : vector<128xf32> to vector<1x128xf32>
    %177 = vector.broadcast %176 : vector<1x128xf32> to vector<16x128xf32>
    %178 = arith.mulf %175, %177 : vector<16x128xf32>
    %179 = arith.addf %172, %178 : vector<16x128xf32>
    %c2_96 = arith.constant 2 : index
    %c4_97 = arith.constant 4 : index
    %c0_98 = arith.constant 0 : index
    %180 = vector.load %arg3[%c2_96, %c4_97, %c0_98] : memref<3x9x128xf32, #tpu.memory_space<vmem>>, vector<1x1x128xf32>
    %181 = vector.shape_cast %180 : vector<1x1x128xf32> to vector<128xf32>
    %182 = vector.shape_cast %181 : vector<128xf32> to vector<1x128xf32>
    %183 = vector.broadcast %182 : vector<1x128xf32> to vector<16x128xf32>
    %184 = arith.mulf %7, %183 : vector<16x128xf32>
    %185 = arith.addf %179, %184 : vector<16x128xf32>
    %c2_99 = arith.constant 2 : index
    %c5_100 = arith.constant 5 : index
    %c0_101 = arith.constant 0 : index
    %186 = vector.load %arg3[%c2_99, %c5_100, %c0_101] : memref<3x9x128xf32, #tpu.memory_space<vmem>>, vector<1x1x128xf32>
    %187 = vector.shape_cast %186 : vector<1x1x128xf32> to vector<128xf32>
    %c104_i32_102 = arith.constant 104 : i32
    %188 = tpu.dynamic_rotate %7 by %c104_i32_102 dim 1 : vector<16x128xf32>, i32 -> vector<16x128xf32>
    %189 = vector.shape_cast %187 : vector<128xf32> to vector<1x128xf32>
    %190 = vector.broadcast %189 : vector<1x128xf32> to vector<16x128xf32>
    %191 = arith.mulf %188, %190 : vector<16x128xf32>
    %192 = arith.addf %185, %191 : vector<16x128xf32>
    %c6_103 = arith.constant 6 : index
    %c0_104 = arith.constant 0 : index
    %193 = vector.load %arg6[%c6_103, %c0_104] : memref<24x128xf32, #tpu.memory_space<vmem>>, vector<16x128xf32>
    %c2_105 = arith.constant 2 : index
    %c6_106 = arith.constant 6 : index
    %c0_107 = arith.constant 0 : index
    %194 = vector.load %arg3[%c2_105, %c6_106, %c0_107] : memref<3x9x128xf32, #tpu.memory_space<vmem>>, vector<1x1x128xf32>
    %195 = vector.shape_cast %194 : vector<1x1x128xf32> to vector<128xf32>
    %c24_i32_108 = arith.constant 24 : i32
    %196 = tpu.dynamic_rotate %193 by %c24_i32_108 dim 1 : vector<16x128xf32>, i32 -> vector<16x128xf32>
    %197 = vector.shape_cast %195 : vector<128xf32> to vector<1x128xf32>
    %198 = vector.broadcast %197 : vector<1x128xf32> to vector<16x128xf32>
    %199 = arith.mulf %196, %198 : vector<16x128xf32>
    %200 = arith.addf %192, %199 : vector<16x128xf32>
    %c2_109 = arith.constant 2 : index
    %c7_110 = arith.constant 7 : index
    %c0_111 = arith.constant 0 : index
    %201 = vector.load %arg3[%c2_109, %c7_110, %c0_111] : memref<3x9x128xf32, #tpu.memory_space<vmem>>, vector<1x1x128xf32>
    %202 = vector.shape_cast %201 : vector<1x1x128xf32> to vector<128xf32>
    %203 = vector.shape_cast %202 : vector<128xf32> to vector<1x128xf32>
    %204 = vector.broadcast %203 : vector<1x128xf32> to vector<16x128xf32>
    %205 = arith.mulf %193, %204 : vector<16x128xf32>
    %206 = arith.addf %200, %205 : vector<16x128xf32>
    %c2_112 = arith.constant 2 : index
    %c8_113 = arith.constant 8 : index
    %c0_114 = arith.constant 0 : index
    %207 = vector.load %arg3[%c2_112, %c8_113, %c0_114] : memref<3x9x128xf32, #tpu.memory_space<vmem>>, vector<1x1x128xf32>
    %208 = vector.shape_cast %207 : vector<1x1x128xf32> to vector<128xf32>
    %c104_i32_115 = arith.constant 104 : i32
    %209 = tpu.dynamic_rotate %193 by %c104_i32_115 dim 1 : vector<16x128xf32>, i32 -> vector<16x128xf32>
    %210 = vector.shape_cast %208 : vector<128xf32> to vector<1x128xf32>
    %211 = vector.broadcast %210 : vector<1x128xf32> to vector<16x128xf32>
    %212 = arith.mulf %209, %211 : vector<16x128xf32>
    %213 = arith.addf %206, %212 : vector<16x128xf32>
    %c2_116 = arith.constant 2 : index
    %c0_117 = arith.constant 0 : index
    %214 = vector.load %arg4[%c2_116, %c0_117] : memref<3x128xf32, #tpu.memory_space<vmem>>, vector<1x128xf32>
    %215 = vector.shape_cast %214 : vector<1x128xf32> to vector<128xf32>
    %216 = vector.shape_cast %215 : vector<128xf32> to vector<1x128xf32>
    %217 = vector.broadcast %216 : vector<1x128xf32> to vector<16x128xf32>
    %218 = arith.addf %213, %217 : vector<16x128xf32>
    %cst_118 = arith.constant 0.000000e+00 : f32
    %219 = vector.broadcast %cst_118 : f32 to vector<16x128xf32>
    %220 = arith.maximumf %218, %219 : vector<16x128xf32>
    %221 = arith.addf %148, %220 : vector<16x128xf32>
    %222 = arith.truncf %221 : vector<16x128xf32> to vector<16x128xbf16>
    %c0_119 = arith.constant 0 : index
    %c2_120 = arith.constant 2 : index
    %c0_121 = arith.constant 0 : index
    %c0_122 = arith.constant 0 : index
    %223 = vector.load %arg5[%c0_119, %c2_120, %c0_121, %c0_122] : memref<1x3x16x128xbf16, #tpu.memory_space<vmem>>, vector<1x1x16x128xbf16>
    %224 = vector.shape_cast %223 : vector<1x1x16x128xbf16> to vector<16x128xbf16>
    %225 = vector.shape_cast %222 : vector<16x128xbf16> to vector<1x1x16x128xbf16>
    tpu.vector_store %arg5[%c0_119, %c2_120, %c0_121, %c0_122], %225 {strides = array<i32>} : memref<1x3x16x128xbf16, #tpu.memory_space<vmem>>, vector<1x1x16x128xbf16>,
    return
  }
  func.func @transform_0(%arg0: i32, %arg1: i32) -> (i32, i32, i32) {
    %c0_i32 = arith.constant 0 : i32
    %c0_i32_0 = arith.constant 0 : i32
    %c0_i32_1 = arith.constant 0 : i32
    return %arg0, %c0_i32, %c0_i32_0 : i32, i32, i32
  }
  func.func @transform_1(%arg0: i32, %arg1: i32) -> (i32, i32, i32) {
    %c0_i32 = arith.constant 0 : i32
    %c0_i32_0 = arith.constant 0 : i32
    %c0_i32_1 = arith.constant 0 : i32
    %c0_i32_2 = arith.constant 0 : i32
    return %c0_i32, %c0_i32_0, %c0_i32_1 : i32, i32, i32
  }
  func.func @transform_2(%arg0: i32, %arg1: i32) -> (i32, i32) {
    %c0_i32 = arith.constant 0 : i32
    %c0_i32_0 = arith.constant 0 : i32
    %c0_i32_1 = arith.constant 0 : i32
    return %c0_i32, %c0_i32_0 : i32, i32
  }
  func.func @transform_3(%arg0: i32, %arg1: i32) -> (i32, i32, i32, i32) {
    %c0_i32 = arith.constant 0 : i32
    %c0_i32_0 = arith.constant 0 : i32
    %c0_i32_1 = arith.constant 0 : i32
    return %arg0, %c0_i32, %arg1, %c0_i32_0 : i32, i32, i32, i32
  }
}

</mosaic_0001>

<bundles_post_ra>
// kernel: tpu_custom_call.1
= control target key start
LH: loop header
LB: loop body
LE: loop exit
PB: predicated region body
PF: predicated region fallthrough
CT: control target
= control target key end

     0   :  { %8 = vsyncpa [#allocation4], 0  ;;  %s1294_s0 = inlined_call_operand.vmem [shape: bf16[2,24,128], index: 0, kind: input, shape index: {}]   ;;  %s1295_s1 = inlined_call_operand.vmem [shape: f32[3,9,128], index: 1, kind: input, shape index: {}]   ;;  %s1296_s2 = inlined_call_operand.vmem [shape: f32[3,128], index: 2, kind: input, shape index: {}]   ;;  %s1297_s3 = inlined_call_operand.hbm [shape: bf16[2,3,16,128], index: 3, kind: output, shape index: {}]  }
   0x1   :  { %10 = vsyncpa [#allocation4 + $0x1], 0  ;;  %s1036_s12 = smov 0   ;;  %s1038_s13 = smov 0  }
   0x2   :  { %s1040_s14 = smov 0   ;;  %s1042_s15 = smov 0  }
   0x3   :  { %s1044_s16 = smov 0   ;;  %s1046_s17 = smov 0  }
   0x4 LB: > { %s677_s18 = sadd.s32 4294967295, %s1005_s17   ;;  %s678_s19 = sadd.s32 4294967294, %s1005_s17   ;;  %s1005_s17 = sphi %s1046_s17, %s16_s17   ;;  %s1001_s16 = sphi %s1044_s16, %s1304_s16   ;;  %s997_s15 = sphi %s1042_s15, %s1303_s15   ;;  %s993_s14 = sphi %s1040_s14, %s1302_s14   ;;  %s989_s13 = sphi %s1038_s13, %s1301_s13   ;;  %s985_s12 = sphi %s1036_s12, %s1300_s12  }
   0x5   : > { %s28_s20 = sadd.s32 1, %s1001_s16  ;;  %s105_s21 = sadd.s32 1, %s993_s14 }
   0x6   : > { %p30_p0 = scmp.ge.s32.totalorder %s28_s20, 2  ;;  %p115_p1 = scmp.ne.s32.totalorder %s993_s14, %s989_s13 }
   0x7   : > { %p116_p2 = scmp.eq.s32.totalorder %s677_s18, 1  ;;  %p121_p3 = scmp.ne.s32.totalorder %s989_s13, %s985_s12 }
   0x8   : > { %s1306_s20 = smov (%p30_p0, %s28_s20), 0  ;;  %p122_p5 = scmp.eq.s32.totalorder %s678_s19, 1 }
   0x9   : > { %p1076_p4 = por %p116_p2, %p115_p1  ;;  %s100_s23 = ssub.s32 %s1001_s16, %s1306_s20 }
   0xa   : > { %p681_p6 = scmp.ge.s32.totalorder %s1005_s17, 1  ;;  %p103_p7 = scmp.eq.s32.totalorder %s100_s23, 0 }
   0xb   : > { %p1083_p8 = por %p122_p5, %p121_p3  ;;  %p154_p9 = scmp.lt.s32.totalorder %s1005_s17, 3 }
   0xc   : > { %s1089_s25 = scalar_select %p103_p7, %s993_s14, %s105_s21  }
   0xd   : > { %p155_p10 = pnand %p681_p6, %p154_p9 }
   0xe   : > { %p178_p11 = scmp.lt.s32.totalorder (!%p155_p10), %s997_s15, 1  ;;  %s1007_s4 = smov (!%p155_p10), 120   ;;  %v684_v24 = vld [vmem:[%s1295_s1 + $0x1] ss:$0 sm:$0xff] (!%p155_p10)  ;;  %v683_v26 = vld [vmem:[%s1295_s1] ss:$0 sm:$0xff] (!%p155_p10) }
   0xf   : > { %158 = sbr.rel (%p155_p10) target bundleno = 219 (0xdb), region = 32  ;;  %s1008_s5 = smov (!%p155_p10), 8   ;;  %v698_v32 = vld [vmem:[%s1295_s1 + $0x11] ss:$0 sm:$0xff] (!%p155_p10)  ;;  %v685_v35 = vld [vmem:[%s1295_s1 + $0x2] ss:$0 sm:$0xff] (!%p155_p10) }
  0x10   : > { %s1009_s6 = smov (!%p155_p10), 112   ;;  %s1010_s7 = smov (!%p155_p10), 16   ;;  %v721_v42 = vld [vmem:[%s1295_s1 + $0x21] ss:$0 sm:$0xff] (!%p155_p10)  ;;  %v687_v43 = vld [vmem:[%s1295_s1 + $0x4] ss:$0 sm:$0xff] (!%p155_p10) }
  0x11   : > { %s1011_s8 = smov (!%p155_p10), 24   ;;  %s1012_s9 = smov (!%p155_p10), 104   ;;  %v700_v46 = vld [vmem:[%s1295_s1 + $0x12] ss:$0 sm:$0xff] (!%p155_p10)  ;;  %v696_v49 = vld [vmem:[%s1295_s1 + $0x10] ss:$0 sm:$0xff] (!%p155_p10) }
  0x12   : > { %v719_v62 = vld [vmem:[%s1295_s1 + $0x20] ss:$0 sm:$0xff] (!%p155_p10)  ;;  %s1013_s18 = smov (!%p155_p10), [#allocation3]  }
  0x13   : > { %s931_s19 = sshll.u32 (!%p155_p10), %s1013_s18, 4  ;;  %s932_s19 = int_to_ptr.vmem [resolvable:$false] %s931_s19 }
  0x14   : > { %s933_s21 = scalar_lea.vmem (!%p155_p10), %s932_s19, 768 }
  0x16   : > { %s179_s26 = scalar_select %p178_p11, %s997_s15, 1 }
  0x18   : > { %s772_s27 = smul.u32 12, %s179_s26 }
  0x1a   : > { %s182_s30 = scalar_lea.vmem %s1294_s0, %s772_s27 }
  0x1b   : > { %v751_v0 = vld [vmem:[%s182_s30] sm:$0xff]   ;;  %v191_v1 = vld [vmem:[%s182_s30 + $0x8] sm:$0xf] }
  0x1c   : > { %v1096_v2 = vunpack.c.l.bf16 %v751_v0  ;;  %v1098_v3 = vunpack.c.h.bf16 %v751_v0  ;;  %v194_v4 = vunpack.c.l.bf16 %v191_v1  ;;  %v686_v0 = vld [vmem:[%s1295_s1 + $0x3] ss:$0 sm:$0xff] }
  0x1e   : > { %195 = vst [vmem:[#allocation2] sm:$0xff] %v1096_v2  ;;  %196 = vst [vmem:[#allocation2 + $0x8] sm:$0xff] %v1098_v3  ;;  %v857_v13 = vpack.i.bf16 %v1098_v3, %v1096_v2  ;;  %v475_v54 = vmul.f32 %v1096_v2, %v721_v42  ;;  %v476_v55 = vmul.f32 %v1098_v3, %v721_v42 }
  0x1f   : > { %197 = vst [vmem:[#allocation2 + $0x10] sm:$0xff] %v194_v4 }
  0x25   : > { %v200_v5 = vld [vmem:[#allocation2 + $0x2] sm:$0xff] }
  0x26   : > { %v201_v6 = vld [vmem:[#allocation2 + $0xa] sm:$0xff]  ;;  %v326_v7 = vld [vmem:[#allocation2 + $0x1] sm:$0xff]  ;;  %v218_v34 = vmul.f32 %v684_v24, %v200_v5 }
  0x27   : > { %v847_v8 = vpack.i.bf16 %v201_v6, %v200_v5  ;;  %v327_v9 = vld [vmem:[#allocation2 + $0x9] sm:$0xff]  ;;  %v219_v33 = vmul.f32 %v684_v24, %v201_v6  ;;  %v345_v39 = vmul.f32 %v698_v32, %v326_v7  ;;  %v704_v6 = vld [vmem:[%s1295_s1 + $0x14] ss:$0 sm:$0xff] }
  0x28   : > { %v852_v10 = vpack.i.bf16 %v327_v9, %v326_v7  ;;  %v1103_v11 = vld [vmem:[#allocation2 + $0x3] sm:$0xff]  ;;  %v1105_v12 = vld [vmem:[#allocation2 + $0xb] sm:$0xff]  ;;  %v346_v40 = vmul.f32 %v698_v32, %v327_v9 }
  0x29   : > { %848 = vrot.lane.b32.xlu1 %v847_v8, %s1007_s4  ;;  %838 = vrot.lane.b32.xlu0 %v847_v8, %s1008_s5  ;;  %v862_v14 = vpack.i.bf16 %v1105_v12, %v1103_v11  ;;  %v1111_v15 = vld [vmem:[#allocation2 + $0x4] sm:$0xff]  ;;  %v1113_v16 = vld [vmem:[#allocation2 + $0xc] sm:$0xff]  ;;  %v254_v56 = vmul.f32 %v687_v43, %v1105_v12  ;;  %v253_v57 = vmul.f32 %v687_v43, %v1103_v11 }
  0x2a   : > { %v892_v17 = vpack.i.bf16 %v1113_v16, %v1111_v15  ;;  %v1118_v18 = vld [vmem:[#allocation2 + $0x5] sm:$0xff]  ;;  %v1120_v19 = vld [vmem:[#allocation2 + $0xd] sm:$0xff]  ;;  %v727_v7 = vld [vmem:[%s1295_s1 + $0x24] ss:$0 sm:$0xff] }
  0x2b   : > { %v897_v20 = vpack.i.bf16 %v1120_v19, %v1118_v18  ;;  %v1124_v21 = vld [vmem:[#allocation2 + $0x6] sm:$0xff]  ;;  %v1126_v22 = vld [vmem:[#allocation2 + $0xe] sm:$0xff] }
  0x2c   : > { %v907_v23 = vpack.i.bf16 %v1126_v22, %v1124_v21 }
  0x2d   : > { %853 = vrot.lane.b32.xlu1 %v852_v10, %s1009_s6  ;;  %843 = vrot.lane.b32.xlu0 %v852_v10, %s1010_s7 }
  0x31   : > { %858 = vrot.lane.b32.xlu0 %v857_v13, %s1011_s8  ;;  %863 = vrot.lane.b32.xlu1 %v862_v14, %s1008_s5 }
  0x35   : > { %868 = vrot.lane.b32.xlu0 %v862_v14, %s1010_s7  ;;  %873 = vrot.lane.b32.xlu1 %v857_v13, %s1012_s9 }
  0x39   : > { %878 = vrot.lane.b32.xlu0 %v862_v14, %s1011_s8  ;;  %883 = vrot.lane.b32.xlu1 %v862_v14, %s1007_s4 }
  0x3d   : > { %888 = vrot.lane.b32.xlu0 %v862_v14, %s1009_s6  ;;  %893 = vrot.lane.b32.xlu1 %v892_v17, %s1008_s5  ;;  %s773_s5 = smul.u32 384, %s997_s15 }
  0x3f   : > { %s1242_s10 = scalar_lea.hbm %s1297_s3, %s773_s5 }
  0x41   : > { %898 = vrot.lane.b32.xlu0 %v897_v20, %s1010_s7  ;;  %903 = vrot.lane.b32.xlu1 %v862_v14, %s1012_s9 }
  0x45   : > { %908 = vrot.lane.b32.xlu0 %v907_v23, %s1011_s8  ;;  %913 = vrot.lane.b32.xlu1 %v892_v17, %s1007_s4 }
  0x49   : > { %918 = vrot.lane.b32.xlu0 %v897_v20, %s1009_s6  ;;  %923 = vrot.lane.b32.xlu1 %v907_v23, %s1012_s9  ;;  %s175_s9 = sand.u32 1, %s989_s13  }
  0x4a   : > { %s771_s26 = smul.u32 24, %s175_s9  ;;  %s1248_s15 = scalar_lea.sflag [#allocation4], %s175_s9 }
  0x4c   : > { %s177_s4 = scalar_lea.vmem [#allocation3], %s771_s26 }
  0x4d   : > { %s602_s6 = sshll.u32 %s177_s4, 4  ;;  %s1244_s6 = int_to_ptr.vmem [resolvable:$true] %s602_s6 }
  0x4e   : > { %s927_s11 = scalar_lea.vmem %s1244_s6, 384  ;;  %p934_p1 = scmp.lt.s32.totalorder %s1244_s6, %s932_s19 }
  0x4f   : > { %p928_p12 = scmp.ne.s32.totalorder %s1244_s6, %s927_s11  ;;  %p935_p2 = scmp.lt.s32.totalorder %s933_s21, %s927_s11 }
  0x51   : > { %p929_p13 = pnand %p928_p12, %p1076_p4  ;;  %p936_p3 = por %p935_p2, %p934_p1 }
  0x53   : > { %p930_p0 = pneg %p929_p13 }
  0x55   : > { %p937_p5 = pnand %p936_p3, %p930_p0 }
  0x9b   : > { %v849_v25 = vpop.permute.xlu1 %848  ;;  %v839_v27 = vpop.permute.xlu0 %838 }
  0x9c   : > { %v851_v28 = vunpack.i.h.bf16 %v849_v25  ;;  %v850_v29 = vunpack.i.l.bf16 %v849_v25  ;;  %v841_v30 = vunpack.i.h.bf16 %v839_v27  ;;  %v840_v31 = vunpack.i.l.bf16 %v839_v27 }
  0x9d   : > { %v380_v27 = vmul.f32 %v704_v6, %v1103_v11 }
  0x9e   : > { %v212_v36 = vmul.f32 %v841_v30, %v683_v26  ;;  %v211_v37 = vmul.f32 %v840_v31, %v683_v26  ;;  %v232_v44 = vmul.f32 %v851_v28, %v685_v35  ;;  %v231_v45 = vmul.f32 %v850_v29, %v685_v35  ;;  %v723_v35 = vld [vmem:[%s1295_s1 + $0x22] ss:$0 sm:$0xff] }
  0x9f   : > { %v854_v38 = vpop.permute.xlu1 %853  ;;  %v844_v41 = vpop.permute.xlu0 %843  ;;  %v381_v26 = vmul.f32 %v704_v6, %v1105_v12  ;;  %v511_v28 = vmul.f32 %v727_v7, %v1105_v12  ;;  %v510_v29 = vmul.f32 %v727_v7, %v1103_v11 }
  0xa0   : > { %v856_v47 = vunpack.i.h.bf16 %v854_v38  ;;  %v855_v48 = vunpack.i.l.bf16 %v854_v38  ;;  %v221_v50 = vadd.f32 %v219_v33, %v212_v36  ;;  %v220_v51 = vadd.f32 %v218_v34, %v211_v37  ;;  %v702_v34 = vld [vmem:[%s1295_s1 + $0x13] ss:$0 sm:$0xff] }
  0xa1   : > { %v846_v52 = vunpack.i.h.bf16 %v844_v41  ;;  %v845_v53 = vunpack.i.l.bf16 %v844_v41 }
  0xa2   : > { %v359_v58 = vmul.f32 %v856_v47, %v700_v46  ;;  %v358_v59 = vmul.f32 %v855_v48, %v700_v46  ;;  %v233_v10 = vadd.f32 %v231_v45, %v220_v51  ;;  %v234_v13 = vadd.f32 %v232_v44, %v221_v50  ;;  %v725_v46 = vld [vmem:[%s1295_s1 + $0x23] ss:$0 sm:$0xff]  ;;  %v688_v48 = vld [vmem:[%s1295_s1 + $0x5] ss:$0 sm:$0xff]  ;;  %v690_v50 = vld [vmem:[%s1295_s1 + $0x7] ss:$0 sm:$0xff] }
  0xa3   : > { %v339_v60 = vmul.f32 %v846_v52, %v696_v49  ;;  %v338_v61 = vmul.f32 %v845_v53, %v696_v49  ;;  %v859_v63 = vpop.permute.xlu0 %858  ;;  %v864_v1 = vpop.permute.xlu1 %863 }
  0xa4   : > { %v861_v2 = vunpack.i.h.bf16 %v859_v63  ;;  %v860_v3 = vunpack.i.l.bf16 %v859_v63  ;;  %v866_v4 = vunpack.i.h.bf16 %v864_v1  ;;  %v865_v5 = vunpack.i.l.bf16 %v864_v1 }
  0xa5   : > { %v348_v8 = vadd.f32 %v346_v40, %v339_v60  ;;  %v347_v9 = vadd.f32 %v345_v39, %v338_v61  ;;  %v290_v1 = vmul.f32 %v690_v50, %v1111_v15 }
  0xa6   : > { %v469_v14 = vmul.f32 %v861_v2, %v719_v62  ;;  %v468_v17 = vmul.f32 %v860_v3, %v719_v62  ;;  %v245_v20 = vmul.f32 %v866_v4, %v686_v0  ;;  %v244_v23 = vmul.f32 %v865_v5, %v686_v0 }
  0xa7   : > { %v869_v24 = vpop.permute.xlu0 %868  ;;  %v874_v25 = vpop.permute.xlu1 %873  ;;  %v360_v32 = vadd.f32 %v358_v59, %v347_v9  ;;  %v361_v33 = vadd.f32 %v359_v58, %v348_v8  ;;  %v710_v59 = vld [vmem:[%s1295_s1 + $0x17] ss:$0 sm:$0xff]  ;;  %v291_v0 = vmul.f32 %v690_v50, %v1113_v16  ;;  %v706_v8 = vld [vmem:[%s1295_s1 + $0x15] ss:$0 sm:$0xff]  ;;  %v689_v9 = vld [vmem:[%s1295_s1 + $0x6] ss:$0 sm:$0xff] }
  0xa8   : > { %v247_v30 = vadd.f32 %v245_v20, %v234_v13  ;;  %v246_v31 = vadd.f32 %v244_v23, %v233_v10  ;;  %v871_v36 = vunpack.i.h.bf16 %v869_v24  ;;  %v870_v37 = vunpack.i.l.bf16 %v869_v24  ;;  %v691_v50 = vld [vmem:[%s1295_s1 + $0x8] ss:$0 sm:$0xff] }
  0xa9   : > { %v876_v38 = vunpack.i.h.bf16 %v874_v25  ;;  %v875_v39 = vunpack.i.l.bf16 %v874_v25  ;;  %v478_v40 = vadd.f32 %v476_v55, %v469_v14  ;;  %v477_v12 = vadd.f32 %v475_v54, %v468_v17 }
  0xaa   : > { %v255_v41 = vadd.f32 %v253_v57, %v246_v31  ;;  %v256_v11 = vadd.f32 %v254_v56, %v247_v30  ;;  %v372_v42 = vmul.f32 %v871_v36, %v702_v34  ;;  %v371_v43 = vmul.f32 %v870_v37, %v702_v34 }
  0xab   : > { %v489_v44 = vmul.f32 %v876_v38, %v723_v35  ;;  %v488_v45 = vmul.f32 %v875_v39, %v723_v35  ;;  %v879_v47 = vpop.permute.xlu0 %878  ;;  %v884_v49 = vpop.permute.xlu1 %883  ;;  %v417_v10 = vmul.f32 %v710_v59, %v1118_v18  ;;  %v418_v16 = vmul.f32 %v710_v59, %v1120_v19  ;;  %v729_v18 = vld [vmem:[%s1295_s1 + $0x25] ss:$0 sm:$0xff] }
  0xac   : > { %v881_v51 = vunpack.i.h.bf16 %v879_v47  ;;  %v880_v52 = vunpack.i.l.bf16 %v879_v47  ;;  %v886_v53 = vunpack.i.h.bf16 %v884_v49  ;;  %v885_v54 = vunpack.i.l.bf16 %v884_v49  ;;  %v731_v49 = vld [vmem:[%s1295_s1 + $0x26] ss:$0 sm:$0xff] }
  0xad   : > { %v374_v55 = vadd.f32 %v372_v42, %v361_v33  ;;  %v373_v56 = vadd.f32 %v371_v43, %v360_v32  ;;  %v491_v57 = vadd.f32 %v489_v44, %v478_v40  ;;  %v490_v58 = vadd.f32 %v488_v45, %v477_v12  ;;  %v708_v32 = vld [vmem:[%s1295_s1 + $0x16] ss:$0 sm:$0xff]  ;;  %v733_v40 = vld [vmem:[%s1295_s1 + $0x27] ss:$0 sm:$0xff] }
  0xae   : > { %v502_v60 = vmul.f32 %v881_v51, %v725_v46  ;;  %v501_v61 = vmul.f32 %v880_v52, %v725_v46  ;;  %v267_v62 = vmul.f32 %v886_v53, %v688_v48  ;;  %v266_v63 = vmul.f32 %v885_v54, %v688_v48 }
  0xaf   : > { %v889_v2 = vpop.permute.xlu0 %888  ;;  %v382_v3 = vadd.f32 %v380_v27, %v373_v56  ;;  %v383_v4 = vadd.f32 %v381_v26, %v374_v55  ;;  %v894_v5 = vpop.permute.xlu1 %893  ;;  %v547_v51 = vmul.f32 %v733_v40, %v1124_v21  ;;  %v548_v52 = vmul.f32 %v733_v40, %v1126_v22  ;;  %v712_v21 = vld [vmem:[%s1295_s1 + $0x18] ss:$0 sm:$0xff]  ;;  %v735_v22 = vld [vmem:[%s1295_s1 + $0x28] ss:$0 sm:$0xff] }
  0xb0   : > { %v503_v6 = vadd.f32 %v501_v61, %v490_v58  ;;  %v504_v7 = vadd.f32 %v502_v60, %v491_v57  ;;  %v891_v13 = vunpack.i.h.bf16 %v889_v2  ;;  %v890_v15 = vunpack.i.l.bf16 %v889_v2 }
  0xb1   : > { %v896_v14 = vunpack.i.h.bf16 %v894_v5  ;;  %v895_v17 = vunpack.i.l.bf16 %v894_v5  ;;  %v268_v20 = vadd.f32 %v266_v63, %v255_v41  ;;  %v269_v23 = vadd.f32 %v267_v62, %v256_v11 }
  0xb2   : > { %v512_v24 = vadd.f32 %v510_v29, %v503_v6  ;;  %v513_v25 = vadd.f32 %v511_v28, %v504_v7  ;;  %v394_v26 = vmul.f32 %v891_v13, %v706_v8  ;;  %v393_v27 = vmul.f32 %v890_v15, %v706_v8 }
  0xb3   : > { %v282_v30 = vmul.f32 %v896_v14, %v689_v9  ;;  %v281_v31 = vmul.f32 %v895_v17, %v689_v9  ;;  %v899_v33 = vpop.permute.xlu0 %898  ;;  %v904_v19 = vpop.permute.xlu1 %903 }
  0xb4   : > { %v901_v34 = vunpack.i.h.bf16 %v899_v33  ;;  %v900_v35 = vunpack.i.l.bf16 %v899_v33  ;;  %v906_v36 = vunpack.i.h.bf16 %v904_v19  ;;  %v905_v37 = vunpack.i.l.bf16 %v904_v19 }
  0xb5   : > { %v395_v29 = vadd.f32 %v393_v27, %v382_v3  ;;  %v396_v28 = vadd.f32 %v394_v26, %v383_v4  ;;  %v283_v38 = vadd.f32 %v281_v31, %v268_v20  ;;  %v284_v39 = vadd.f32 %v282_v30, %v269_v23  ;;  %v692_v3 = vld [vmem:[%s1296_s2] ss:$0 sm:$0xff]  ;;  %v736_v31 = vld [vmem:[%s1296_s2 + $0x2] ss:$0 sm:$0xff] }
  0xb6   : > { %v409_v12 = vmul.f32 %v901_v34, %v708_v32  ;;  %v408_v41 = vmul.f32 %v900_v35, %v708_v32  ;;  %v524_v11 = vmul.f32 %v906_v36, %v729_v18  ;;  %v523_v42 = vmul.f32 %v905_v37, %v729_v18 }
  0xb7   : > { %v909_v43 = vpop.permute.xlu0 %908  ;;  %v914_v44 = vpop.permute.xlu1 %913  ;;  %v292_v45 = vadd.f32 %v290_v1, %v283_v38  ;;  %v293_v46 = vadd.f32 %v291_v0, %v284_v39 }
  0xb8   : > { %v410_v47 = vadd.f32 %v408_v41, %v395_v29  ;;  %v411_v48 = vadd.f32 %v409_v12, %v396_v28  ;;  %v911_v53 = vunpack.i.h.bf16 %v909_v43  ;;  %v910_v54 = vunpack.i.l.bf16 %v909_v43 }
  0xb9   : > { %v916_v55 = vunpack.i.h.bf16 %v914_v44  ;;  %v915_v56 = vunpack.i.l.bf16 %v914_v44  ;;  %v525_v57 = vadd.f32 %v523_v42, %v512_v24  ;;  %v526_v58 = vadd.f32 %v524_v11, %v513_v25  ;;  %v713_v24 = vld [vmem:[%s1296_s2 + $0x1] ss:$0 sm:$0xff] }
  0xba   : > { %v419_v59 = vadd.f32 %v417_v10, %v410_v47  ;;  %v420_v60 = vadd.f32 %v418_v16, %v411_v48  ;;  %v539_v61 = vmul.f32 %v911_v53, %v731_v49  ;;  %v538_v62 = vmul.f32 %v910_v54, %v731_v49 }
  0xbb   : > { %v304_v63 = vmul.f32 %v916_v55, %v691_v50  ;;  %v303_v0 = vmul.f32 %v915_v56, %v691_v50  ;;  %v919_v1 = vpop.permute.xlu0 %918  ;;  %v924_v2 = vpop.permute.xlu1 %923 }
  0xbc   : > { %v921_v4 = vunpack.i.h.bf16 %v919_v1  ;;  %v920_v5 = vunpack.i.l.bf16 %v919_v1  ;;  %v926_v6 = vunpack.i.h.bf16 %v924_v2  ;;  %v925_v7 = vunpack.i.l.bf16 %v924_v2 }
  0xbd   : > { %v540_v8 = vadd.f32 %v538_v62, %v525_v57  ;;  %v541_v9 = vadd.f32 %v539_v61, %v526_v58  ;;  %v305_v10 = vadd.f32 %v303_v0, %v292_v45  ;;  %v306_v16 = vadd.f32 %v304_v63, %v293_v46 }
  0xbe   : > { %v431_v13 = vmul.f32 %v921_v4, %v712_v21  ;;  %v430_v15 = vmul.f32 %v920_v5, %v712_v21  ;;  %v561_v14 = vmul.f32 %v926_v6, %v735_v22  ;;  %v560_v17 = vmul.f32 %v925_v7, %v735_v22 }
  0xbf   : > { %v312_v20 = vadd.f32 %v692_v3, %v305_v10  ;;  %v313_v23 = vadd.f32 %v692_v3, %v306_v16  ;;  %v549_v25 = vadd.f32 %v547_v51, %v540_v8  ;;  %v550_v26 = vadd.f32 %v548_v52, %v541_v9 }
  0xc0   : > { %v432_v27 = vadd.f32 %v430_v15, %v419_v59  ;;  %v433_v30 = vadd.f32 %v431_v13, %v420_v60 }
  0xc1   : > { %v314_v32 = vmax.f32 %v312_v20, 0.0  ;;  %v315_v33 = vmax.f32 %v313_v23, 0.0  ;;  %v562_v18 = vadd.f32 %v560_v17, %v549_v25  ;;  %v563_v19 = vadd.f32 %v561_v14, %v550_v26 }
  0xc2   : > { %v439_v34 = vadd.f32 %v713_v24, %v432_v27  ;;  %v440_v35 = vadd.f32 %v713_v24, %v433_v30 }
  0xc3   : > { %v757_v36 = vpack.c.bf16 %v315_v33, %v314_v32  ;;  %v569_v37 = vadd.f32 %v736_v31, %v562_v18  ;;  %v570_v29 = vadd.f32 %v736_v31, %v563_v19 }
  0xc4   : > { %v441_v28 = vmax.f32 %v439_v34, 0.0  ;;  %v442_v38 = vmax.f32 %v440_v35, 0.0 }
  0xc5   : > { %758 = vst [vmem:[%s177_s4] sm:$0xff] %v757_v36   ;;  %v571_v12 = vmax.f32 %v569_v37, 0.0  ;;  %v572_v41 = vmax.f32 %v570_v29, 0.0 }
  0xc6   : > { %v443_v39 = vadd.f32 %v441_v28, %v314_v32  ;;  %v444_v40 = vadd.f32 %v442_v38, %v315_v33 }
  0xc8   : > { %v762_v11 = vpack.c.bf16 %v444_v40, %v443_v39  ;;  %v573_v42 = vadd.f32 %v571_v12, %v443_v39  ;;  %v574_v43 = vadd.f32 %v572_v41, %v444_v40 }
  0xca   : > { %769 = vst [vmem:[%s177_s4 + $0x8] sm:$0xff] %v762_v11   ;;  %v767_v44 = vpack.c.bf16 %v574_v43, %v573_v42 }
  0xcc   : > { %770 = vst [vmem:[%s177_s4 + $0x10] sm:$0xff] %v767_v44  }
  0xcd   : > { %940 = shalt.err (!%p937_p5)
}
  0xce   : > { %s941_s9 = scalar_lea.hbm %s1242_s10, 384  ;;  %s945_s27 = scalar_lea.hbm %s1297_s3, 768 }
  0xcf   : > { %p942_p6 = scmp.ne.s32.totalorder %s1242_s10, %s941_s9  ;;  %p946_p10 = scmp.lt.u32.totalorder %s1242_s10, %s1297_s3 }
  0xd0   : > { %p947_p11 = scmp.lt.u32.totalorder %s945_s27, %s941_s9  ;;  %p949_p13 = scmp.lt.u32.totalorder %s941_s9, %s1242_s10 }
  0xd1   : > { %p943_p7 = pnand %p942_p6, %p1076_p4 }
  0xd2   : > { %p948_p12 = por %p947_p11, %p946_p10 }
  0xd3   : > { %p944_p9 = pneg %p943_p7 }
  0xd4   : > { %p950_p0 = por %p949_p13, %p948_p12 }
  0xd6   : > { %p951_p1 = pnand %p950_p0, %p944_p9 }
  0xd8   : > { %954 = shalt.err (!%p951_p1)
}
  0xd9   : > { %s1014_s30 = smov 64   ;;  %s1015_s4 = smov 4  }
  0xda   : > { %774 = dma.vmem_to_hbm [thread:$0]  (%p1076_p4), %s1244_s6, 384, %s1242_s10, %s1248_s15, %s1014_s30, %s1014_s30, %s1015_s4  }
  0xdb PF: > { %p780_p2 = scmp.ge.s32.totalorder %s1005_s17, 2  ;;  %s617_s5 = sand.u32 1, %s985_s12  }
  0xdc   : > { %s618_s7 = scalar_lea.sflag [#allocation4], %s617_s5 }
  0xdd   : > { %p777_p3 = pnand %p780_p2, %p1083_p8 }
  0xdf   : > { %980 = dma.done.wait (!%p777_p3), %s618_s7, 384  }
  0xe0   : > { %982 = vsyncadd (!%p777_p3), %s618_s7, 4294966912  ;;  %s16_s17 = sadd.s32 1, %s1005_s17   ;;  %s1300_s12 = smov %s989_s13 }
  0xe1   : > { %p13_p5 = scmp.ge.s32.totalorder %s16_s17, 4   ;;  %s1301_s13 = smov %s993_s14 }
  0xe2   : > { %s1302_s14 = smov %s1089_s25  ;;  %s1303_s15 = smov %s1001_s16 }
  0xe3   : > { %s1304_s16 = smov %s1306_s20  ;;  %15 = sbr.rel (!%p13_p5) target bundleno = 4 (0x4), region = 72 }
  0xea   :  { %623 = vsyncpa [#allocation4], 1 }
  0xeb   :  { %625 = vsyncpa [#allocation4 + $0x1], 1 }

</bundles_post_ra>
